<compile_context>
chip_gen: v5e
topology: v5e:2x2
jax: 0.10.0
libtpu: 0.0.40
codegen_flags: <defaults>
</compile_context>

<pallas_src>
import functools

import numpy as np
import jax
import jax.numpy as jnp
from jax import lax
from jax.experimental import pallas as pl
from jax.experimental.pallas import tpu as pltpu

_BIG = 1e30


@functools.lru_cache(maxsize=1)
def _physical_vmem_bytes():
    try:
        return int(pltpu.get_tpu_info().vmem_capacity_bytes)
    except Exception:
        return 64 * 1024 * 1024  # conservative fallback (v7x per-core VMEM)


def _round_up(v, m):
    return (v + m - 1) // m * m


def _pick_block_rows(n):
    """Lane-dense anchor blocks: prefer 256 (fills the 256-wide MXU on v6e/v7x),
    then 128; prefer >= 2 blocks so the 'parallel' grid axis can shard across the
    two v7x TensorCores.  Budget the (n, bm) f32 temporaries against physical VMEM
    (tighter cap on v7x's 64 MiB than on v5e/v6e's 128 MiB)."""
    phys = _physical_vmem_bytes()
    tile_cap = (8 << 20) if phys >= (100 << 20) else (4 << 20)
    for need_two_blocks in (True, False):
        for cand in (256, 128):
            if n % cand != 0 or n * cand * 4 > tile_cap:
                continue
            if need_two_blocks and n // cand < 2:
                continue
            return cand
    if n % 128 == 0:
        return 128  # TODO(synk): column-tile the sample axis instead for huge n
    return n


def _eet_block_kernel(x_all_ref, x_anc_ref, sq_all_ref, sq_anc_ref,
                      cls_all_ref, cls_anc_ref, m_ref, stats_ref,
                      *, class_counts, c_pad):
    """One block of anchors (lanes) against all class-sorted samples (sublanes).

    Outputs (lane-dense, anchors along lanes, SQUARED distances):
      m_ref     (c_pad, bm): m[c, i] = min_{j in class c} dist^2(x_j, anchor_i)
                             (rows >= C padded with _BIG)
      stats_ref (8, bm):     rows 0/1 = hardest-positive / hardest-negative dist^2
                             rows 2/3 = their sample indices (exact f32 integers)
    """
    x_all = x_all_ref[...]          # (n,  d) f32  class-sorted samples
    x_anc = x_anc_ref[...]          # (bm, d) f32  this block's anchors
    sq_all = sq_all_ref[...]        # (n,  1) f32  hoisted ||x_j||^2
    sq_anc = sq_anc_ref[...]        # (1, bm) f32  hoisted ||anchor_i||^2
    cls_all = cls_all_ref[...]      # (n,  1) i32
    cls_anc = cls_anc_ref[...]      # (1, bm) i32

    n_all = x_all.shape[0]
    bm = x_anc.shape[0]

    # Gram block on the MXU (contract feature dims of both operands; anchors on lanes).
    g = lax.dot_general(x_all, x_anc, (((1,), (1,)), ((), ())),
                        preferred_element_type=jnp.float32)            # (n, bm)
    # Squared distances, clamped like the reference (sqrt deferred to the wrapper).
    dist_sq = jnp.maximum(sq_all + sq_anc - 2.0 * g, 1e-12)            # (n, bm)

    same = cls_all == cls_anc                                          # (n, bm) bool

    # Hardest positive / negative per anchor; masked tiles reused for the index pass.
    ap_masked = jnp.where(same, dist_sq, -_BIG)
    an_masked = jnp.where(same, _BIG, dist_sq)
    ap = jnp.max(ap_masked, axis=0, keepdims=True)                     # (1, bm)
    an = jnp.min(an_masked, axis=0, keepdims=True)                     # (1, bm)

    iota_col = lax.broadcasted_iota(jnp.int32, (n_all, 1), 0)          # broadcast iota
    p_idx = jnp.min(jnp.where(ap_masked == ap, iota_col, n_all),
                    axis=0, keepdims=True)                             # (1, bm)
    n_idx = jnp.min(jnp.where(an_masked == an, iota_col, n_all),
                    axis=0, keepdims=True)                             # (1, bm)

    # Per-class min: contiguous (class-sorted) sublane segments -> ONE pass over dist_sq.
    rows = []
    off = 0
    for cnt in class_counts:
        rows.append(jnp.min(dist_sq[off:off + cnt, :], axis=0, keepdims=True))
        off += cnt
    pad = c_pad - len(class_counts)
    if pad:
        rows.append(jnp.full((pad, bm), _BIG, dtype=jnp.float32))
    m_ref[...] = jnp.concatenate(rows, axis=0)                         # full-tile store

    stats_ref[...] = jnp.concatenate(
        [ap, an, p_idx.astype(jnp.float32), n_idx.astype(jnp.float32),
         jnp.zeros((4, bm), jnp.float32)], axis=0)                     # full-tile store


def _losses_from_parts(ap, an, d_pn, D_cc, num_classes, margin):
    """Tiny glue: class-level (loss_ec2) + anchor-level (loss_mc, loss_ec1) terms."""
    C = num_classes
    eye_c = jnp.eye(C, dtype=bool)
    D_off = jnp.where(eye_c, _BIG, D_cc)
    v = jnp.min(D_off, axis=1)                  # nearest-class distance per class
    bstar = jnp.argmin(D_off, axis=1)           # nearest class id per class
    loss_e = jnp.mean(jnp.abs(v - v[bstar]))
    loss_m = jnp.sum(jnp.where(eye_c, 0.0, jnp.exp(-D_cc))) / (C * (C - 1))
    loss_ec2 = loss_m + loss_e
    # nn.MarginRankingLoss(margin)(dist_an, dist_ap, y=1), mean reduction
    loss_mc = jnp.mean(jnp.maximum(0.0, ap - an + margin))
    loss_ec1 = jnp.mean(jnp.abs(an - d_pn))
    return loss_ec2 + loss_mc + loss_ec1


@functools.partial(jax.jit, static_argnames=("class_counts", "block_rows"))
def _eet_loss_sorted(inputs, perm, margin, *, class_counts, block_rows=None):
    """Core jitted path.  `perm` sorts samples by (remapped) class; `class_counts`
    is the static per-class sample count (all > 0, classes 0..C-1 in order)."""
    x = inputs.astype(jnp.float32)
    n, d = x.shape
    C = len(class_counts)
    if C < 2:
        raise ValueError("EETLoss needs at least two classes in the batch")
    if sum(class_counts) != n:
        raise ValueError("class_counts must sum to the batch size")

    bm = int(block_rows) if block_rows is not None else _pick_block_rows(n)
    if n % bm != 0 or (bm != n and bm % 128 != 0):
        raise ValueError(f"block_rows={bm} must divide n={n} and be a multiple of "
                         "128 (or equal n)")
    num_blocks = n // bm
    c_pad = _round_up(C, 8)

    x_s = x[perm]                                        # class-sorted rows, O(n*d)
    cls_sorted = np.repeat(np.arange(C, dtype=np.int32), class_counts)  # static const
    cls_col = jnp.asarray(cls_sorted.reshape(n, 1))      # class id per sample
    cls_row = jnp.asarray(cls_sorted.reshape(1, n))      # class id per anchor

    sq_vec = jnp.sum(x_s * x_s, axis=1)                  # hoisted ||x||^2 (once)
    sq_col = sq_vec.reshape(n, 1)
    sq_row = sq_vec.reshape(1, n)

    kernel = functools.partial(_eet_block_kernel,
                               class_counts=tuple(class_counts), c_pad=c_pad)

    vmem_est = 4 * (7 * n * bm + 2 * n * d + 2 * bm * d + 2 * (c_pad + 8) * bm + 6 * n)
    vmem_cap = (_physical_vmem_bytes() * 7) // 8         # headroom on v7x's 64 MiB
    compiler_params = pltpu.CompilerParams(
        dimension_semantics=("parallel",),
        vmem_limit_bytes=int(min(vmem_cap, max(32 * 1024 * 1024, vmem_est))),
    )
    cost = pl.CostEstimate(
        flops=int(2 * n * n * d + 12 * n * n + 3 * n * d),
        transcendentals=0,
        bytes_accessed=int(4 * (2 * n * d + 4 * n + (c_pad + 8) * n)),
    )

    m_sq, stats = pl.pallas_call(
        kernel,
        out_shape=(jax.ShapeDtypeStruct((c_pad, n), jnp.float32),
                   jax.ShapeDtypeStruct((8, n), jnp.float32)),
        grid_spec=pltpu.PrefetchScalarGridSpec(
            num_scalar_prefetch=0,
            grid=(num_blocks,),
            in_specs=[
                pl.BlockSpec((n, d), lambda i: (0, 0)),    # all samples (grid-invariant)
                pl.BlockSpec((bm, d), lambda i: (i, 0)),   # this block's anchors
                pl.BlockSpec((n, 1), lambda i: (0, 0)),    # ||x||^2 per sample
                pl.BlockSpec((1, bm), lambda i: (0, i)),   # ||x||^2 per anchor
                pl.BlockSpec((n, 1), lambda i: (0, 0)),    # class id per sample
                pl.BlockSpec((1, bm), lambda i: (0, i)),   # class id per anchor
            ],
            out_specs=[
                pl.BlockSpec((c_pad, bm), lambda i: (0, i)),  # per-class min dist^2
                pl.BlockSpec((8, bm), lambda i: (0, i)),      # ap^2/an^2/p_idx/n_idx
            ],
        ),
        compiler_params=compiler_params,
        cost_estimate=cost,
    )(x_s, x_s, sq_col, sq_row, cls_col, cls_row)

    ap = jnp.sqrt(stats[0])                               # sqrt only on reduced outputs
    an = jnp.sqrt(stats[1])
    p_idx = stats[2].astype(jnp.int32)                    # exact f32 integers
    n_idx = stats[3].astype(jnp.int32)

    # dist_pn = dist[hardest_pos, hardest_neg], reconstructed in O(n*d).
    xp = x_s[p_idx]
    xn = x_s[n_idx]
    d_pn = jnp.sqrt(jnp.maximum(
        sq_vec[p_idx] + sq_vec[n_idx] - 2.0 * jnp.sum(xp * xn, axis=1), 1e-12))

    # D_cc[a, b] = min over anchors i in class a of m_sq[b, i]  (contiguous segments)
    mT = m_sq[:C]
    d_rows = []
    off = 0
    for cnt in class_counts:
        d_rows.append(jnp.min(mT[:, off:off + cnt], axis=1))
        off += cnt
    D_cc = jnp.sqrt(jnp.stack(d_rows, axis=0))            # (C, C)

    return _losses_from_parts(ap, an, d_pn, D_cc, C, margin)


def eet_loss(inputs, targets, margin=0.3, block_rows=None):
    """Original-style interface taking raw integer labels.  Label remapping and
    class grouping (the PyTorch module's defaultdict loops) run on the host with
    np.unique/argsort, OUTSIDE the jitted hot path."""
    t = np.asarray(targets).reshape(-1)
    _, inv = np.unique(t, return_inverse=True)
    counts = np.bincount(inv)
    perm = np.argsort(inv, kind="stable")
    return _eet_loss_sorted(inputs, jnp.asarray(perm, jnp.int32),
                            jnp.float32(margin),
                            class_counts=tuple(int(c) for c in counts),
                            block_rows=block_rows)


eet_loss_from_labels = eet_loss


@functools.partial(jax.jit, static_argnames=("num_classes",))
def eet_loss_reference(inputs, class_ids, *, num_classes, margin=0.3):
    """Dense O(n^2) pure-JAX reference mirroring the PyTorch module (for checking)."""
    x = inputs.astype(jnp.float32)
    cls = class_ids.astype(jnp.int32)
    C = int(num_classes)

    sq = jnp.sum(x * x, axis=1, keepdims=True)
    dist = jnp.sqrt(jnp.maximum(sq + sq.T - 2.0 * (x @ x.T), 1e-12))
    same = cls[:, None] == cls[None, :]

    ap = jnp.max(jnp.where(same, dist, -_BIG), axis=1)
    an = jnp.min(jnp.where(same, _BIG, dist), axis=1)
    p_idx = jnp.argmax(jnp.where(same, dist, -_BIG), axis=1)
    n_idx = jnp.argmin(jnp.where(same, _BIG, dist), axis=1)
    d_pn = dist[p_idx, n_idx]

    onehot = cls[None, :] == jnp.arange(C, dtype=jnp.int32)[:, None]             # (C, n)
    mT = jnp.min(jnp.where(onehot[:, :, None], dist[None, :, :], _BIG), axis=1)  # (C, n)
    D_cc = jnp.min(jnp.where(onehot[:, None, :], mT[None, :, :], _BIG), axis=2)  # (C, C)

    return _losses_from_parts(ap, an, d_pn, D_cc, C, margin)


if __name__ == "__main__":
    key = jax.random.PRNGKey(0)
    k1, k2 = jax.random.split(key)

    # Case 1: small batch, shuffled labels, UNEVEN class sizes (3/2/3); single block.
    n1, d1 = 8, 32
    x1 = jax.random.normal(k1, (n1, d1), dtype=jnp.float32)
    t1 = jnp.array([2, 0, 1, 0, 2, 0, 1, 2], dtype=jnp.int32)
    loss1 = eet_loss(x1, t1, margin=0.3)
    ids1 = jnp.asarray(np.unique(np.asarray(t1), return_inverse=True)[1], jnp.int32)
    ref1 = eet_loss_reference(x1, ids1, num_classes=3, margin=0.3)

    # Case 2: exercises the tiled "parallel" anchor-block path (grid=(2,), bm=128).
    n2, d2, C2 = 256, 64, 8
    x2 = jax.random.normal(k2, (n2, d2), dtype=jnp.float32)
    t2 = jnp.arange(n2, dtype=jnp.int32) % C2                  # 8 classes x 32 samples
    loss2 = eet_loss(x2, t2, margin=0.3)
    ref2 = eet_loss_reference(x2, t2, num_classes=C2, margin=0.3)

    jax.block_until_ready((loss1, ref1, loss2, ref2))
    np.testing.assert_allclose(np.asarray(loss1), np.asarray(ref1), rtol=5e-2, atol=5e-2)
    np.testing.assert_allclose(np.asarray(loss2), np.asarray(ref2), rtol=5e-2, atol=5e-2)
    print("KERNEL_OK")
</pallas_src>

<mosaic_0001>
module attributes {stable_mosaic.version = 11 : i64} {
  func.func @_eet_block_kernel(%arg0: i32, %arg1: memref<8x32xf32, #tpu.memory_space<vmem>>, %arg2: memref<8x32xf32, #tpu.memory_space<vmem>>, %arg3: memref<8x1xf32, #tpu.memory_space<vmem>>, %arg4: memref<1x8xf32, #tpu.memory_space<vmem>>, %arg5: memref<8x1xi32, #tpu.memory_space<vmem>>, %arg6: memref<1x8xi32, #tpu.memory_space<vmem>>, %arg7: memref<8x8xf32, #tpu.memory_space<vmem>>, %arg8: memref<8x8xf32, #tpu.memory_space<vmem>>) attributes {dimension_semantics = [#tpu.dimension_semantics<parallel>], iteration_bounds = array<i64: 1>, scalar_prefetch = 0 : i64, scratch_operands = 0 : i64, tpu.core_type = #tpu.core_type<tc>, window_params = [{pipeline_mode = #tpu.pipeline_mode<synchronous>, transform_indices = @transform_0, window_bounds = array<i64: 8, 32>}, {transform_indices = @transform_1, window_bounds = array<i64: 8, 32>}, {pipeline_mode = #tpu.pipeline_mode<synchronous>, transform_indices = @transform_2, window_bounds = array<i64: 8, 1>}, {transform_indices = @transform_3, window_bounds = array<i64: 1, 8>}, {pipeline_mode = #tpu.pipeline_mode<synchronous>, transform_indices = @transform_4, window_bounds = array<i64: 8, 1>}, {transform_indices = @transform_5, window_bounds = array<i64: 1, 8>}, {transform_indices = @transform_6, window_bounds = array<i64: 8, 8>}, {transform_indices = @transform_7, window_bounds = array<i64: 8, 8>}]} {
    %c0 = arith.constant 0 : index
    %c0_0 = arith.constant 0 : index
    %0 = vector.load %arg1[%c0, %c0_0] : memref<8x32xf32, #tpu.memory_space<vmem>>, vector<8x32xf32>
    %c0_1 = arith.constant 0 : index
    %c0_2 = arith.constant 0 : index
    %1 = vector.load %arg2[%c0_1, %c0_2] : memref<8x32xf32, #tpu.memory_space<vmem>>, vector<8x32xf32>
    %c0_3 = arith.constant 0 : index
    %c0_4 = arith.constant 0 : index
    %2 = vector.load %arg3[%c0_3, %c0_4] : memref<8x1xf32, #tpu.memory_space<vmem>>, vector<8x1xf32>
    %c0_5 = arith.constant 0 : index
    %c0_6 = arith.constant 0 : index
    %3 = vector.load %arg4[%c0_5, %c0_6] : memref<1x8xf32, #tpu.memory_space<vmem>>, vector<1x8xf32>
    %c0_7 = arith.constant 0 : index
    %c0_8 = arith.constant 0 : index
    %4 = vector.load %arg5[%c0_7, %c0_8] : memref<8x1xi32, #tpu.memory_space<vmem>>, vector<8x1xi32>
    %c0_9 = arith.constant 0 : index
    %c0_10 = arith.constant 0 : index
    %5 = vector.load %arg6[%c0_9, %c0_10] : memref<1x8xi32, #tpu.memory_space<vmem>>, vector<1x8xi32>
    %cst = arith.constant dense<0.000000e+00> : vector<8x8xf32>
    %6 = tpu.matmul %0, %1, %cst {dimension_numbers = #tpu.dot_dimension_numbers<[1], [1], [0], [0], [0, 0, 1, 0], [], []>} : vector<8x32xf32>, vector<8x32xf32>, vector<8x8xf32> -> vector<8x8xf32>
    %7 = vector.broadcast %2 : vector<8x1xf32> to vector<8x8xf32>
    %8 = vector.broadcast %3 : vector<1x8xf32> to vector<8x8xf32>
    %9 = arith.addf %7, %8 : vector<8x8xf32>
    %cst_11 = arith.constant 2.000000e+00 : f32
    %10 = vector.broadcast %cst_11 : f32 to vector<8x8xf32>
    %11 = arith.mulf %10, %6 : vector<8x8xf32>
    %12 = arith.subf %9, %11 : vector<8x8xf32>
    %cst_12 = arith.constant 9.99999996E-13 : f32
    %13 = vector.broadcast %cst_12 : f32 to vector<8x8xf32>
    %14 = arith.maximumf %12, %13 : vector<8x8xf32>
    %15 = vector.broadcast %4 : vector<8x1xi32> to vector<8x8xi32>
    %16 = vector.broadcast %5 : vector<1x8xi32> to vector<8x8xi32>
    %17 = arith.cmpi eq, %15, %16 : vector<8x8xi32>
    %cst_13 = arith.constant -1.000000e+30 : f32
    %18 = vector.broadcast %cst_13 : f32 to vector<8x8xf32>
    %19 = arith.select %17, %14, %18 : vector<8x8xi1>, vector<8x8xf32>
    %cst_14 = arith.constant 1.000000e+30 : f32
    %20 = vector.broadcast %cst_14 : f32 to vector<8x8xf32>
    %21 = arith.select %17, %20, %14 : vector<8x8xi1>, vector<8x8xf32>
    %cst_15 = arith.constant dense<0xFF800000> : vector<8xf32>
    %22 = vector.multi_reduction <maximumf>, %19, %cst_15 [0] : vector<8x8xf32> to vector<8xf32>
    %23 = vector.shape_cast %22 : vector<8xf32> to vector<1x8xf32>
    %cst_16 = arith.constant dense<0x7F800000> : vector<8xf32>
    %24 = vector.multi_reduction <minimumf>, %21, %cst_16 [0] : vector<8x8xf32> to vector<8xf32>
    %25 = vector.shape_cast %24 : vector<8xf32> to vector<1x8xf32>
    %26 = tpu.iota {dimensions = array<i32: 0>} : vector<8x1xi32>
    %27 = vector.broadcast %23 : vector<1x8xf32> to vector<8x8xf32>
    %28 = arith.cmpf oeq, %19, %27 : vector<8x8xf32>
    %c8_i32 = arith.constant 8 : i32
    %29 = vector.shape_cast %26 : vector<8x1xi32> to vector<8x1xi32>
    %30 = vector.broadcast %29 : vector<8x1xi32> to vector<8x8xi32>
    %31 = vector.broadcast %c8_i32 : i32 to vector<8x8xi32>
    %32 = arith.select %28, %30, %31 : vector<8x8xi1>, vector<8x8xi32>
    %cst_17 = arith.constant dense<2147483647> : vector<8xi32>
    %33 = vector.multi_reduction <minsi>, %32, %cst_17 [0] : vector<8x8xi32> to vector<8xi32>
    %34 = vector.shape_cast %33 : vector<8xi32> to vector<1x8xi32>
    %35 = vector.broadcast %25 : vector<1x8xf32> to vector<8x8xf32>
    %36 = arith.cmpf oeq, %21, %35 : vector<8x8xf32>
    %c8_i32_18 = arith.constant 8 : i32
    %37 = vector.shape_cast %26 : vector<8x1xi32> to vector<8x1xi32>
    %38 = vector.broadcast %37 : vector<8x1xi32> to vector<8x8xi32>
    %39 = vector.broadcast %c8_i32_18 : i32 to vector<8x8xi32>
    %40 = arith.select %36, %38, %39 : vector<8x8xi1>, vector<8x8xi32>
    %cst_19 = arith.constant dense<2147483647> : vector<8xi32>
    %41 = vector.multi_reduction <minsi>, %40, %cst_19 [0] : vector<8x8xi32> to vector<8xi32>
    %42 = vector.shape_cast %41 : vector<8xi32> to vector<1x8xi32>
    %43 = vector.extract_strided_slice %14 {offsets = [0, 0], sizes = [3, 8], strides = [1, 1]} : vector<8x8xf32> to vector<3x8xf32>
    %cst_20 = arith.constant dense<0x7F800000> : vector<8xf32>
    %44 = vector.multi_reduction <minimumf>, %43, %cst_20 [0] : vector<3x8xf32> to vector<8xf32>
    %45 = vector.shape_cast %44 : vector<8xf32> to vector<1x8xf32>
    %46 = vector.extract_strided_slice %14 {offsets = [3, 0], sizes = [2, 8], strides = [1, 1]} : vector<8x8xf32> to vector<2x8xf32>
    %cst_21 = arith.constant dense<0x7F800000> : vector<8xf32>
    %47 = vector.multi_reduction <minimumf>, %46, %cst_21 [0] : vector<2x8xf32> to vector<8xf32>
    %48 = vector.shape_cast %47 : vector<8xf32> to vector<1x8xf32>
    %49 = vector.extract_strided_slice %14 {offsets = [5, 0], sizes = [3, 8], strides = [1, 1]} : vector<8x8xf32> to vector<3x8xf32>
    %cst_22 = arith.constant dense<0x7F800000> : vector<8xf32>
    %50 = vector.multi_reduction <minimumf>, %49, %cst_22 [0] : vector<3x8xf32> to vector<8xf32>
    %51 = vector.shape_cast %50 : vector<8xf32> to vector<1x8xf32>
    %cst_23 = arith.constant 1.000000e+30 : f32
    %52 = vector.broadcast %cst_23 : f32 to vector<5x8xf32>
    %53 = tpu.concatenate %45, %48, %51, %52 in 0 : vector<1x8xf32>, vector<1x8xf32>, vector<1x8xf32>, vector<5x8xf32> -> vector<8x8xf32>
    %c0_24 = arith.constant 0 : index
    %c0_25 = arith.constant 0 : index
    %54 = vector.load %arg7[%c0_24, %c0_25] : memref<8x8xf32, #tpu.memory_space<vmem>>, vector<8x8xf32>
    tpu.vector_store %arg7[%c0_24, %c0_25], %53 {strides = array<i32>} : memref<8x8xf32, #tpu.memory_space<vmem>>, vector<8x8xf32>,
    %55 = arith.sitofp %34 : vector<1x8xi32> to vector<1x8xf32>
    %56 = arith.sitofp %42 : vector<1x8xi32> to vector<1x8xf32>
    %cst_26 = arith.constant 0.000000e+00 : f32
    %57 = vector.broadcast %cst_26 : f32 to vector<4x8xf32>
    %58 = tpu.concatenate %23, %25, %55, %56, %57 in 0 : vector<1x8xf32>, vector<1x8xf32>, vector<1x8xf32>, vector<1x8xf32>, vector<4x8xf32> -> vector<8x8xf32>
    %c0_27 = arith.constant 0 : index
    %c0_28 = arith.constant 0 : index
    %59 = vector.load %arg8[%c0_27, %c0_28] : memref<8x8xf32, #tpu.memory_space<vmem>>, vector<8x8xf32>
    tpu.vector_store %arg8[%c0_27, %c0_28], %58 {strides = array<i32>} : memref<8x8xf32, #tpu.memory_space<vmem>>, vector<8x8xf32>,
    return
  }
  func.func @transform_0(%arg0: i32) -> (i32, i32) {
    %c0_i32 = arith.constant 0 : i32
    %c0_i32_0 = arith.constant 0 : i32
    %c0_i32_1 = arith.constant 0 : i32
    return %c0_i32, %c0_i32_0 : i32, i32
  }
  func.func @transform_1(%arg0: i32) -> (i32, i32) {
    %c0_i32 = arith.constant 0 : i32
    %c0_i32_0 = arith.constant 0 : i32
    return %arg0, %c0_i32 : i32, i32
  }
  func.func @transform_2(%arg0: i32) -> (i32, i32) {
    %c0_i32 = arith.constant 0 : i32
    %c0_i32_0 = arith.constant 0 : i32
    %c0_i32_1 = arith.constant 0 : i32
    return %c0_i32, %c0_i32_0 : i32, i32
  }
  func.func @transform_3(%arg0: i32) -> (i32, i32) {
    %c0_i32 = arith.constant 0 : i32
    %c0_i32_0 = arith.constant 0 : i32
    return %c0_i32, %arg0 : i32, i32
  }
  func.func @transform_4(%arg0: i32) -> (i32, i32) {
    %c0_i32 = arith.constant 0 : i32
    %c0_i32_0 = arith.constant 0 : i32
    %c0_i32_1 = arith.constant 0 : i32
    return %c0_i32, %c0_i32_0 : i32, i32
  }
  func.func @transform_5(%arg0: i32) -> (i32, i32) {
    %c0_i32 = arith.constant 0 : i32
    %c0_i32_0 = arith.constant 0 : i32
    return %c0_i32, %arg0 : i32, i32
  }
  func.func @transform_6(%arg0: i32) -> (i32, i32) {
    %c0_i32 = arith.constant 0 : i32
    %c0_i32_0 = arith.constant 0 : i32
    return %c0_i32, %arg0 : i32, i32
  }
  func.func @transform_7(%arg0: i32) -> (i32, i32) {
    %c0_i32 = arith.constant 0 : i32
    %c0_i32_0 = arith.constant 0 : i32
    return %c0_i32, %arg0 : i32, i32
  }
}

</mosaic_0001>

<bundles_post_ra>
// kernel: _eet_loss_sorted.1
= control target key start
LH: loop header
LB: loop body
LE: loop exit
PB: predicated region body
PF: predicated region fallthrough
CT: control target
= control target key end

     0   :  { %vm31_vm0 = vcmask 261120   ;;  %v171_v1 = vmov 0   ;;  %vm118_vm1 = vcmask 59392   ;;  %vm126_vm2 = vcmask 61443   ;;  %s248_s1 = inlined_call_operand.vmem [shape: f32[8,32], index: 1, kind: input, shape index: {}, may-alias: {0,1}]   ;;  %s249_s2 = inlined_call_operand.vmem [shape: f32[8,1], index: 2, kind: input, shape index: {}]   ;;  %s250_s0 = inlined_call_operand.vmem [shape: f32[8,32], index: 0, kind: input, shape index: {}, may-alias: {0,1}]   ;;  %s251_s3 = inlined_call_operand.vmem [shape: f32[1,8], index: 3, kind: input, shape index: {}]   ;;  %s252_s5 = inlined_call_operand.vmem [shape: s32[1,8], index: 5, kind: input, shape index: {}]   ;;  %s253_s4 = inlined_call_operand.vmem [shape: s32[8,1], index: 4, kind: input, shape index: {}]   ;;  %s254_s6 = inlined_call_operand.vmem [shape: f32[8,8], index: 6, kind: output, shape index: {0}]   ;;  %s255_s7 = inlined_call_operand.vmem [shape: f32[8,8], index: 7, kind: output, shape index: {1}]  }
   0x1   :  { %v26_v0 = vld [vmem:[%s248_s1] sm:$0xff]  ;;  %168 = vset.pattern.permute.xlu0 %v171_v1  ;;  %vm77_vm3 = vcmask 64512   ;;  %vm134_vm5 = vcmask 64517   ;;  %v92_v35 = vlaneseq  ;;  %vm142_vm6 = vcmask 1040384  }
   0x2   :  { %v27_v2 = vld [vmem:[%s249_s2] sm:$0xff]  ;;  %165 = vmatpush.xpose.msk.msra.mxu0 %vm31_vm0, %v26_v0  ;;  %vm144_vm7 = vcmask 1041408   ;;  %vm146_vm8 = vcmask 1042432  }
   0x3   :  { %60 = vperm.xlu0 %168, %v27_v2   ;;  %v25_v3 = vld [vmem:[%s250_s0] sm:$0xff]  ;;  %v93_v46 = vshrl.u32 %v92_v35, 7 }
   0x4   :  { %v29_v4 = vld [vmem:[%s253_s4] sm:$0xff] }
   0x5   :  { %166 = vmatmul.msk.f32.vlgmr.msra.gmra.mxu0 %vm31_vm0, %v25_v3  ;;  %v169_v6 = vld [vmem:[%s251_s3] ss:$0 sm:$0xff] }
   0x6   :  { %v170_v10 = vld [vmem:[%s252_s5] ss:$0 sm:$0xff] }
   0xb   :  { %71 = vperm.xlu0 %168, %v29_v4  }
  0x75   :  { %v61_v5 = vpop.permute.xlu0 %60 }
  0x76   :  { %v66_v8 = vadd.f32 %v169_v6, %v61_v5 }
  0x7d   :  { %v72_v11 = vpop.permute.xlu0 %71 }
  0x7e   :  { %vm74_vm4 = vcmp.eq.s32.totalorder %v72_v11, %v170_v10 }
  0x82   :  { %v55_v7 = vpop.f32.mrf.mxu0 }
  0x83   :  { %v67_v9 = vmul.f32 2.0, %v55_v7 }
  0x85   :  { %v68_v12 = vsub.f32 %v66_v8, %v67_v9 }
  0x87   :  { %v69_v13 = vmax.f32 %v68_v12, 1e-12 }
  0x89   :  { %v75_v14 = vsel %vm74_vm4, %v69_v13, -1e+30  ;;  %v76_v15 = vsel %vm74_vm4, 1e+30, %v69_v13  ;;  %v119_v16 = vsel %vm118_vm1, %v69_v13, inf  ;;  %v127_v17 = vsel %vm126_vm2, %v69_v13, inf }
  0x8a   :  { %v78_v18 = vsel %vm77_vm3, %v75_v14, -inf  ;;  %v85_v19 = vsel %vm77_vm3, %v76_v15, inf  ;;  %v120_v20 = vrot.slane %v119_v16, 4  ;;  %v128_v21 = vrot.slane %v127_v17, 4 }
  0x8b   :  { %v79_v22 = vrot.slane %v78_v18, 4  ;;  %v86_v23 = vrot.slane %v85_v19, 4  ;;  %v135_v24 = vsel %vm134_vm5, %v69_v13, inf  ;;  %vm154_vm1 = vcmask 1043456  }
  0x8c   :  { %v121_v25 = vmin.f32 %v119_v16, %v120_v20  ;;  %v129_v26 = vmin.f32 %v127_v17, %v128_v21  ;;  %v136_v27 = vrot.slane %v135_v24, 4 }
  0x8d   :  { %v80_v28 = vmax.f32 %v78_v18, %v79_v22  ;;  %v87_v29 = vmin.f32 %v85_v19, %v86_v23 }
  0x8e   :  { %v122_v30 = vrot.slane %v121_v25, 2  ;;  %v130_v31 = vrot.slane %v129_v26, 2  ;;  %v137_v32 = vmin.f32 %v135_v24, %v136_v27 }
  0x8f   :  { %v81_v33 = vrot.slane %v80_v28, 2  ;;  %v88_v34 = vrot.slane %v87_v29, 2 }
  0x90   :  { %v123_v36 = vmin.f32 %v121_v25, %v122_v30  ;;  %v131_v37 = vmin.f32 %v129_v26, %v130_v31  ;;  %v138_v38 = vrot.slane %v137_v32, 2 }
  0x91   :  { %v82_v39 = vmax.f32 %v80_v28, %v81_v33  ;;  %v89_v40 = vmin.f32 %v87_v29, %v88_v34 }
  0x92   :  { %v124_v41 = vrot.slane %v123_v36, 1  ;;  %v132_v42 = vrot.slane %v131_v37, 1  ;;  %v139_v43 = vmin.f32 %v137_v32, %v138_v38 }
  0x93   :  { %v83_v44 = vrot.slane %v82_v39, 1  ;;  %v90_v45 = vrot.slane %v89_v40, 1 }
  0x94   :  { %v125_v47 = vmin.f32 %v123_v36, %v124_v41  ;;  %v133_v48 = vmin.f32 %v131_v37, %v132_v42  ;;  %v140_v49 = vrot.slane %v139_v43, 1 }
  0x95   :  { %v84_v50 = vmax.f32 %v82_v39, %v83_v44  ;;  %v91_v51 = vmin.f32 %v89_v40, %v90_v45 }
  0x96   :  { %v141_v52 = vmin.f32 %v139_v43, %v140_v49  ;;  %v143_v53 = vsel %vm142_vm6, %v125_v47, %v133_v48 }
  0x97   :  { %vm94_vm9 = vcmp.eq.f32.partialorder %v75_v14, %v84_v50  ;;  %vm106_vm10 = vcmp.eq.f32.partialorder %v76_v15, %v91_v51  ;;  %v151_v10 = vsel %vm142_vm6, %v84_v50, %v91_v51 }
  0x98   :  { %v95_v54 = vsel %vm94_vm9, %v93_v46, 8  ;;  %v107_v55 = vsel %vm106_vm10, %v93_v46, 8  ;;  %v145_v56 = vsel %vm144_vm7, %v143_v53, %v141_v52 }
  0x99   :  { %v96_v57 = vsel %vm77_vm3, %v95_v54, 2147483647  ;;  %v108_v58 = vsel %vm77_vm3, %v107_v55, 2147483647  ;;  %v147_v59 = vsel %vm146_vm8, %v145_v56, 1e+30 }
  0x9a   :  { %v97_v60 = vrot.slane %v96_v57, 4  ;;  %v109_v61 = vrot.slane %v108_v58, 4  ;;  %148 = vst.msk [vmem:[%s254_s6] sm:$0xff] %vm77_vm3, %v147_v59 }
  0x9c   :  { %vm98_vm11 = vcmp.lt.s32.totalorder %v96_v57, %v97_v60  ;;  %vm110_vm12 = vcmp.lt.s32.totalorder %v108_v58, %v109_v61 }
  0x9d   :  { %v99_v62 = vsel %vm98_vm11, %v96_v57, %v97_v60  ;;  %v111_v63 = vsel %vm110_vm12, %v108_v58, %v109_v61 }
  0x9e   :  { %v100_v0 = vrot.slane %v99_v62, 2  ;;  %v112_v1 = vrot.slane %v111_v63, 2 }
  0xa0   :  { %vm101_vm13 = vcmp.lt.s32.totalorder %v99_v62, %v100_v0  ;;  %vm113_vm14 = vcmp.lt.s32.totalorder %v111_v63, %v112_v1 }
  0xa1   :  { %v102_v2 = vsel %vm101_vm13, %v99_v62, %v100_v0  ;;  %v114_v3 = vsel %vm113_vm14, %v111_v63, %v112_v1 }
  0xa2   :  { %v103_v4 = vrot.slane %v102_v2, 1  ;;  %v115_v5 = vrot.slane %v114_v3, 1 }
  0xa4   :  { %vm104_vm15 = vcmp.lt.s32.totalorder %v102_v2, %v103_v4  ;;  %vm116_vm0 = vcmp.lt.s32.totalorder %v114_v3, %v115_v5 }
  0xa5   :  { %v105_v6 = vsel %vm104_vm15, %v102_v2, %v103_v4  ;;  %v117_v7 = vsel %vm116_vm0, %v114_v3, %v115_v5 }
  0xa6   :  { %v149_v8 = vcvt.s32.f32 %v105_v6  ;;  %v150_v9 = vcvt.s32.f32 %v117_v7 }
  0xa8   :  { %v152_v11 = vsel %vm144_vm7, %v151_v10, %v149_v8 }
  0xa9   :  { %v153_v12 = vsel %vm146_vm8, %v152_v11, %v150_v9 }
  0xaa   :  { %v155_v13 = vsel %vm154_vm1, %v153_v12, 0.0 }
  0xab   :  { %156 = vst.msk [vmem:[%s255_s7] sm:$0xff] %vm77_vm3, %v155_v13 }

</bundles_post_ra>
